<compile_context>
chip_gen: v7x
topology: tpu7x:2x2x1
jax: 0.10.0
libtpu: 0.0.40
codegen_flags: <defaults>
</compile_context>

<pallas_src>
import functools
import math

import jax
import jax.numpy as jnp
from jax.experimental import pallas as pl
from jax.experimental.pallas import tpu as pltpu


def _rmsnorm_kernel(x_ref, scale_ref, o_ref, *, d, eps):
    # x_ref: (tm, d_pad) tile of rows; scale_ref: (1, d_pad), already float32.
    # `d` is the ORIGINAL (un-padded) feature size used for the 1/sqrt(d) factor.
    #
    # Pass 1: sum of squares. The f32 copy is consumed immediately by the lane
    # reduction, so it can be streamed instead of held live across the tile.
    x = x_ref[...].astype(jnp.float32)
    ssq = jnp.sum(x * x, axis=-1, keepdims=True)            # (tm, 1)
    # L2 norm -> RMS (matches torch.norm(2, dim=-1, keepdim=True) * d**-0.5).
    rms_x = jnp.sqrt(ssq) * (float(d) ** -0.5)
    # eps added to the RMS OUTSIDE the sqrt, exactly as in the reference.
    inv = pl.reciprocal(rms_x + eps, approx=False)           # (tm, 1), EUP path
    # Pass 2: re-read x (native dtype) and normalize / scale / store.
    x2 = x_ref[...].astype(jnp.float32)
    o_ref[...] = (scale_ref[...] * (x2 * inv)).astype(o_ref.dtype)


def _round_up(x, m):
    return ((x + m - 1) // m) * m


def _vmem_budget_bytes():
    """~75% of this generation's physical VMEM (per TensorCore)."""
    try:
        cap = pltpu.get_tpu_info().vmem_capacity_bytes
    except Exception:
        cap = 64 * 1024 * 1024   # conservative fallback (v7x-sized)
    return int(cap) * 3 // 4


def _pick_row_tile(rows, d_pad, dtype, vmem_budget_bytes):
    """Largest row tile (multiple of the packed sublane count, capped at 1024)
    whose double-buffered in/out tiles + streamed f32 temp fit the budget,
    while keeping the grid at >= 2 steps so v7x can use both TensorCores."""
    dtype_bytes = jnp.dtype(dtype).itemsize
    pack = max(8, 32 // max(dtype_bytes, 1))      # 8 f32, 16 bf16, 32 int8/fp8
    # 2x in + 2x out pipeline buffers (native dtype) + ~1 streamed f32 temp.
    bytes_per_row = d_pad * (4 * dtype_bytes + 4)
    row_tile = vmem_budget_bytes // max(bytes_per_row, 1)
    row_tile = max(pack, min(1024, row_tile))
    # Never ask for (much) more than the array actually has.
    row_tile = min(row_tile, _round_up(rows, pack))
    # Megacore guard: ensure at least 2 grid steps whenever rows allow it.
    if rows > pack:
        half = _round_up(rows, 2) // 2
        half = max(pack, (half // pack) * pack)
        row_tile = min(row_tile, half)
    return max(pack, (row_tile // pack) * pack)


def rmsnorm(x, scale, *, eps=1e-8, row_tile=None, vmem_budget_bytes=None):
    """x: [..., d]; scale: [d]. RMSNorm over the last axis (p disabled, no bias)."""
    orig_shape = x.shape
    d = orig_shape[-1]
    rows = math.prod(orig_shape[:-1]) if len(orig_shape) > 1 else 1
    x2d = x.reshape(rows, d)
    # Hoist the cast: scale enters the kernel already in f32.
    scale2d = scale.reshape(1, d).astype(jnp.float32)

    # Lane-dense output: pad the feature dim to a multiple of 128 so stores are
    # full-width. Zero padding is numerically safe (0 contribution to sum of
    # squares; the original d is still used inside the kernel).
    d_pad = _round_up(d, 128)
    if d_pad != d:
        x2d = jnp.pad(x2d, ((0, 0), (0, d_pad - d)))
        scale2d = jnp.pad(scale2d, ((0, 0), (0, d_pad - d)))

    if vmem_budget_bytes is None:
        vmem_budget_bytes = _vmem_budget_bytes()

    dtype_bytes = jnp.dtype(x.dtype).itemsize
    pack = max(8, 32 // max(dtype_bytes, 1))
    if row_tile is None:
        row_tile = _pick_row_tile(rows, d_pad, x.dtype, vmem_budget_bytes)
    else:
        row_tile = max(pack, (row_tile // pack) * pack)

    grid = (pl.cdiv(rows, row_tile),)
    kernel = functools.partial(_rmsnorm_kernel, d=d, eps=eps)

    out = pl.pallas_call(
        kernel,
        out_shape=jax.ShapeDtypeStruct((rows, d_pad), x.dtype),
        grid_spec=pltpu.PrefetchScalarGridSpec(
            num_scalar_prefetch=0,
            grid=grid,
            in_specs=[
                pl.BlockSpec((row_tile, d_pad), lambda i: (i, 0)),
                pl.BlockSpec((1, d_pad), lambda i: (0, 0)),
            ],
            out_specs=pl.BlockSpec((row_tile, d_pad), lambda i: (i, 0)),
        ),
        compiler_params=pltpu.CompilerParams(
            # "parallel" so v7x shards row-tiles across its 2 TensorCores.
            dimension_semantics=("parallel",),
            # Same number that sized the tiles; generation-aware.
            vmem_limit_bytes=vmem_budget_bytes,
        ),
    )(x2d, scale2d)

    if d_pad != d:
        out = out[:, :d]
    return out.reshape(orig_shape)


def rmsnorm_reference(x, scale, eps=1e-8):
    d = x.shape[-1]
    xf = x.astype(jnp.float32)
    norm_x = jnp.linalg.norm(xf, axis=-1, keepdims=True)
    rms_x = norm_x * (d ** -0.5)
    return (scale.astype(jnp.float32) * (xf / (rms_x + eps))).astype(x.dtype)


if __name__ == "__main__":
    key = jax.random.PRNGKey(0)
    batch, seq, hidden = 2, 8, 32

    x = jax.random.normal(key, (batch, seq, hidden), dtype=jnp.float32)
    # Deterministic parameter init matching nn.Parameter(torch.ones(d)):
    scale = jnp.ones((hidden,), dtype=jnp.float32)

    out = rmsnorm(x, scale, eps=1e-8)
    out = jax.block_until_ready(out)

    ref = rmsnorm_reference(x, scale, eps=1e-8)
    assert out.shape == x.shape
    assert jnp.allclose(out, ref, atol=1e-5, rtol=1e-5), "mismatch vs reference"

    print("KERNEL_OK")
</pallas_src>

<mosaic_0001>
module attributes {stable_mosaic.version = 11 : i64} {
  func.func @_rmsnorm_kernel(%arg0: i32, %arg1: memref<8x128xf32, #tpu.memory_space<vmem>>, %arg2: memref<1x128xf32, #tpu.memory_space<vmem>>, %arg3: memref<8x128xf32, #tpu.memory_space<vmem>>) attributes {dimension_semantics = [#tpu.dimension_semantics<parallel>], iteration_bounds = array<i64: 2>, scalar_prefetch = 0 : i64, scratch_operands = 0 : i64, tpu.core_type = #tpu.core_type<tc>, window_params = [{transform_indices = @transform_0, window_bounds = array<i64: 8, 128>}, {pipeline_mode = #tpu.pipeline_mode<synchronous>, transform_indices = @transform_1, window_bounds = array<i64: 1, 128>}, {transform_indices = @transform_2, window_bounds = array<i64: 8, 128>}]} {
    %c0 = arith.constant 0 : index
    %c0_0 = arith.constant 0 : index
    %0 = vector.load %arg1[%c0, %c0_0] : memref<8x128xf32, #tpu.memory_space<vmem>>, vector<8x128xf32>
    %1 = arith.mulf %0, %0 : vector<8x128xf32>
    %cst = arith.constant dense<0.000000e+00> : vector<8xf32>
    %2 = vector.multi_reduction <add>, %1, %cst [1] : vector<8x128xf32> to vector<8xf32>
    %3 = vector.shape_cast %2 : vector<8xf32> to vector<8x1xf32>
    %4 = math.sqrt %3 : vector<8x1xf32>
    %cst_1 = arith.constant 0.176776692 : f32
    %5 = vector.broadcast %cst_1 : f32 to vector<8x1xf32>
    %6 = arith.mulf %4, %5 : vector<8x1xf32>
    %cst_2 = arith.constant 9.99999993E-9 : f32
    %7 = vector.broadcast %cst_2 : f32 to vector<8x1xf32>
    %8 = arith.addf %6, %7 : vector<8x1xf32>
    %9 = tpu.reciprocal %8 : vector<8x1xf32> -> vector<8x1xf32>
    %c0_3 = arith.constant 0 : index
    %c0_4 = arith.constant 0 : index
    %10 = vector.load %arg1[%c0_3, %c0_4] : memref<8x128xf32, #tpu.memory_space<vmem>>, vector<8x128xf32>
    %c0_5 = arith.constant 0 : index
    %c0_6 = arith.constant 0 : index
    %11 = vector.load %arg2[%c0_5, %c0_6] : memref<1x128xf32, #tpu.memory_space<vmem>>, vector<1x128xf32>
    %12 = vector.broadcast %9 : vector<8x1xf32> to vector<8x128xf32>
    %13 = arith.mulf %10, %12 : vector<8x128xf32>
    %14 = vector.broadcast %11 : vector<1x128xf32> to vector<8x128xf32>
    %15 = arith.mulf %14, %13 : vector<8x128xf32>
    %c0_7 = arith.constant 0 : index
    %c0_8 = arith.constant 0 : index
    %16 = vector.load %arg3[%c0_7, %c0_8] : memref<8x128xf32, #tpu.memory_space<vmem>>, vector<8x128xf32>
    tpu.vector_store %arg3[%c0_7, %c0_8], %15 {strides = array<i32>} : memref<8x128xf32, #tpu.memory_space<vmem>>, vector<8x128xf32>,
    return
  }
  func.func @transform_0(%arg0: i32) -> (i32, i32) {
    %c0_i32 = arith.constant 0 : i32
    %c0_i32_0 = arith.constant 0 : i32
    return %arg0, %c0_i32 : i32, i32
  }
  func.func @transform_1(%arg0: i32) -> (i32, i32) {
    %c0_i32 = arith.constant 0 : i32
    %c0_i32_0 = arith.constant 0 : i32
    %c0_i32_1 = arith.constant 0 : i32
    return %c0_i32, %c0_i32_0 : i32, i32
  }
  func.func @transform_2(%arg0: i32) -> (i32, i32) {
    %c0_i32 = arith.constant 0 : i32
    %c0_i32_0 = arith.constant 0 : i32
    return %arg0, %c0_i32 : i32, i32
  }
}

</mosaic_0001>

<bundles_post_ra>
// kernel: tpu_custom_call.1
= control target key start
LH: loop header
LB: loop body
LE: loop exit
PB: predicated region body
PF: predicated region fallthrough
CT: control target
= control target key end

     0   :  { %7 = vsyncpa [#allocation3], 0  ;;  %s609_s0 = inlined_call_operand.hbm [shape: f32[16,128], index: 0, kind: input, shape index: {}]   ;;  %s610_s1 = inlined_call_operand.vmem [shape: f32[1,128], index: 1, kind: input, shape index: {}]   ;;  %s611_s2 = inlined_call_operand.hbm [shape: f32[16,128], index: 2, kind: output, shape index: {}]  }
   0x1   :  { %9 = vsyncpa [#allocation3 + $0x1], 0 }
   0x2   :  { %10 = vsyncpa [#allocation4], 0 }
   0x3   :  { %12 = vsyncpa [#allocation4 + $0x1], 0  ;;  %s445_s9 = smov 0   ;;  %s447_s10 = smov 0  }
   0x4   :  { %s449_s11 = smov 0   ;;  %s451_s12 = smov 0  }
   0x5 LB: > { %s466_s13 = sadd.s32 4294967295, %s426_s12   ;;  %s267_s14 = sadd.s32 4294967294, %s426_s12   ;;  %s426_s12 = sphi %s451_s12, %s626_s12   ;;  %s422_s11 = sphi %s449_s11, %s625_s11   ;;  %s418_s10 = sphi %s447_s10, %s624_s10   ;;  %s414_s9 = sphi %s445_s9, %s623_s9  }
   0x6   : > { %s470_s15 = sadd.s32 1, %s426_s12   ;;  %s25_s16 = sadd.s32 1, %s422_s11 }
   0x7   : > { %s22_s17 = ssub.s32 %s426_s12, %s470_s15  ;;  %p32_p0 = scmp.ne.s32.totalorder %s422_s11, %s418_s10 }
   0x8   : > { %p23_p1 = scmp.eq.s32.totalorder %s22_s17, 0  ;;  %p33_p2 = scmp.eq.s32.totalorder %s426_s12, 0 }
   0x9   : > { %p38_p3 = scmp.ne.s32.totalorder %s418_s10, %s414_s9  ;;  %p39_p4 = scmp.eq.s32.totalorder %s466_s13, 0 }
   0xa   : > { %s482_s18 = scalar_select %p23_p1, %s422_s11, %s25_s16  }
   0xb   : > { %p484_p5 = por %p33_p2, %p32_p0  ;;  %p488_p6 = por %p39_p4, %p38_p3 }
   0xc   : > { %p83_p7 = scmp.eq.s32.totalorder %s466_s13, 1  ;;  %p89_p8 = scmp.eq.s32.totalorder %s267_s14, 1 }
   0xd   : > { %p292_p10 = scmp.lt.s32.totalorder %s426_s12, 2  ;;  %s112_s23 = sand.u32 1, %s422_s11  }
   0xe   : > { %p495_p11 = por %p83_p7, %p32_p0  ;;  %p499_p12 = por %p89_p8, %p38_p3 }
   0xf   : > { %s271_s24 = sshll.u32 %s426_s12, 7  ;;  %s270_s25 = sshll.u32 %s112_s23, 3 }
  0x10   : > { %s615_s21 = scalar_select %p495_p11, 1, 0 }
  0x11   : > { %s616_s22 = scalar_select %p499_p12, 1, 0 }
  0x12   : > { %s508_s28 = scalar_lea.hbm %s609_s0, %s271_s24  ;;  %s116_s29 = scalar_lea.vmem [#allocation2], %s270_s25 }
  0x13   : > { %s123_s30 = sshll.u32 %s116_s29, 4  ;;  %p512_p13 = pnand %p292_p10, %p484_p5  ;;  %s516_s30 = int_to_ptr.vmem [resolvable:$true] %s123_s30 }
  0x14   : > { %s113_s4 = scalar_lea.sflag [#allocation3], %s112_s23  ;;  %s330_s5 = scalar_lea.hbm %s508_s28, 128 }
  0x15   : > { %p331_p2 = scmp.ne.s32.totalorder %s508_s28, %s330_s5  ;;  %p332_p3 = pneg %p512_p13 }
  0x16   : > { %s335_s8 = scalar_lea.hbm %s609_s0, 256  ;;  %p336_p5 = scmp.lt.u32.totalorder %s508_s28, %s609_s0 }
  0x17   : > { %p333_p4 = pnand %p332_p3, %p331_p2  ;;  %p337_p8 = scmp.lt.u32.totalorder %s335_s8, %s330_s5 }
  0x18   : > { %p339_p9 = scmp.lt.u32.totalorder %s330_s5, %s508_s28 }
  0x19   : > { %p334_p7 = pneg %p333_p4  ;;  %p338_p10 = por %p337_p8, %p336_p5 }
  0x1b   : > { %p340_p0 = por %p339_p9, %p338_p10 }
  0x1d   : > { %p341_p1 = pnand %p340_p0, %p334_p7 }
  0x1f   : > { %344 = shalt.err (!%p341_p1)
}
  0x20   : > { %s345_s17 = scalar_lea.vmem %s516_s30, 128  ;;  %s428_s19 = smov [#allocation2]  }
  0x21   : > { %p346_p2 = scmp.ne.s32.totalorder %s516_s30, %s345_s17  ;;  %s350_s23 = sshll.u32 %s428_s19, 4  ;;  %s351_s23 = int_to_ptr.vmem [resolvable:$false] %s350_s23 }
  0x22   : > { %s352_s24 = scalar_lea.vmem %s351_s23, 256  ;;  %p353_p11 = scmp.lt.s32.totalorder %s516_s30, %s351_s23 }
  0x23   : > { %p348_p4 = pnand %p346_p2, %p332_p3  ;;  %p354_p5 = scmp.lt.s32.totalorder %s352_s24, %s345_s17 }
  0x25   : > { %p349_p12 = pneg %p348_p4  ;;  %p355_p8 = por %p354_p5, %p353_p11 }
  0x27   : > { %p356_p9 = pnand %p355_p8, %p349_p12 }
  0x29   : > { %359 = shalt.err (!%p356_p9)
}
  0x2a   : > { %287 = dma.hbm_to_vmem [thread:$0]  (!%p512_p13), %s508_s28, 128, %s516_s30, %s113_s4  }
  0x2b   : > { %p618_p0 = scmp.lt.s32.totalorder %s426_s12, 3  ;;  %p619_p1 = scmp.ge.s32.totalorder %s426_s12, 1 }
  0x2d   : > { %p129_p3 = pnand %p619_p1, %p618_p0 }
  0x2e   : > { %s550_s25 = sand.u32 (!%p129_p3), 1, %s418_s10  }
  0x2f   : > { %132 = sbr.rel (%p129_p3) target bundleno = 248 (0xf8), region = 28  ;;  %s273_s26 = sshll.u32 (!%p129_p3), %s550_s25, 3 }
  0x30   : > { %s135_s27 = scalar_lea.sflag (!%p129_p3), [#allocation3], %s550_s25  ;;  %s138_s29 = scalar_lea.vmem (!%p129_p3), [#allocation2], %s273_s26 }
  0x36   : > { %405 = dma.done.wait (%p488_p6), %s135_s27, 128  }
  0x37   : > { %407 = vsyncadd (%p488_p6), %s135_s27, 4294967168  ;;  %v159_v0 = vld [vmem:[%s138_s29] sm:$0xff]  ;;  %s277_s30 = sshll.u32 %s466_s13, 7  ;;  %s158_s3 = scalar_lea.vmem [#allocation5], %s273_s26 }
  0x38   : > { %v160_v1 = vmul.f32 %v159_v0, %v159_v0  ;;  %v275_v11 = vld [vmem:[%s610_s1] ss:$0 sm:$0xff]  ;;  %s197_s4 = sshll.u32 %s158_s3, 4  ;;  %s565_s7 = scalar_lea.hbm %s611_s2, %s277_s30  ;;  %s567_s4 = int_to_ptr.vmem [resolvable:$true] %s197_s4 }
  0x39   : > { %s184_s8 = scalar_lea.sflag [#allocation4], %s550_s25  ;;  %s360_s14 = scalar_lea.vmem %s567_s4, 128 }
  0x3a   : > { %161 = vadd.xlane.f32.xlu0 %v160_v1  ;;  %p361_p6 = scmp.ne.s32.totalorder %s567_s4, %s360_s14  ;;  %p620_p11 = scmp.ne.s32.totalorder %s615_s21, 0 }
  0x3b   : > { %s429_s13 = smov [#allocation5]  }
  0x3c   : > { %p362_p12 = pnand %p361_p6, %p620_p11  ;;  %s364_s16 = sshll.u32 %s429_s13, 4  ;;  %s365_s16 = int_to_ptr.vmem [resolvable:$false] %s364_s16 }
  0x3d   : > { %s366_s17 = scalar_lea.vmem %s365_s16, 256  ;;  %p367_p7 = scmp.lt.s32.totalorder %s567_s4, %s365_s16 }
  0x3e   : > { %p363_p13 = pneg %p362_p12  ;;  %p368_p10 = scmp.lt.s32.totalorder %s366_s17, %s360_s14 }
  0x40   : > { %p369_p2 = por %p368_p10, %p367_p7 }
  0x42   : > { %p370_p4 = pnand %p369_p2, %p363_p13 }
  0xc7   : > { %v162_v2 = vpop.xlane.xlu0 %161 }
  0xc8   : > { %326 = vrsqrt.f32 %v162_v2  ;;  %vm165_vm0 = vcmp.eq.f32.partialorder %v162_v2, inf  ;;  %v168_v5 = vand.u32 2147483648, %v162_v2  ;;  %vm167_vm1 = vcmp.eq.f32.partialorder %v162_v2, 0.0 }
  0xd2   : > { %v327_v3 = vpop.eup %326 }
  0xd3   : > { %v164_v4 = vmul.f32 %v327_v3, %v162_v2 }
  0xd5   : > { %v166_v6 = vsel %vm165_vm0, %v162_v2, %v164_v4 }
  0xd6   : > { %v169_v7 = vsel %vm167_vm1, %v168_v5, %v166_v6 }
  0xd7   : > { %v170_v8 = vmul.f32 0.17677669, %v169_v7 }
  0xd9   : > { %v171_v9 = vadd.f32 1e-08, %v170_v8 }
  0xdb   : > { %328 = vrcp.f32 %v171_v9 }
  0xe5   : > { %v329_v10 = vpop.eup %328 }
  0xe6   : > { %v174_v12 = vmul.f32 %v329_v10, %v159_v0 }
  0xe8   : > { %v181_v13 = vmul.f32 %v275_v11, %v174_v12 }
  0xea   : > { %182 = vst [vmem:[%s158_s3] sm:$0xff] %v181_v13 }
  0xeb   : > { %373 = shalt.err (!%p370_p4)
}
  0xec   : > { %s374_s19 = scalar_lea.hbm %s565_s7, 128  ;;  %s378_s25 = scalar_lea.hbm %s611_s2, 256 }
  0xed   : > { %p375_p5 = scmp.ne.s32.totalorder %s565_s7, %s374_s19  ;;  %p379_p0 = scmp.lt.u32.totalorder %s565_s7, %s611_s2 }
  0xee   : > { %p380_p1 = scmp.lt.u32.totalorder %s378_s25, %s374_s19  ;;  %p382_p6 = scmp.lt.u32.totalorder %s374_s19, %s565_s7 }
  0xef   : > { %p376_p8 = pnand %p375_p5, %p620_p11 }
  0xf0   : > { %p381_p3 = por %p380_p1, %p379_p0 }
  0xf1   : > { %p377_p9 = pneg %p376_p8 }
  0xf2   : > { %p383_p12 = por %p382_p6, %p381_p3 }
  0xf4   : > { %p384_p13 = pnand %p383_p12, %p377_p9 }
  0xf6   : > { %387 = shalt.err (!%p384_p13)
}
  0xf7   : > { %282 = dma.vmem_to_hbm [thread:$0]  (%p620_p11), %s567_s4, 128, %s565_s7, %s184_s8  }
  0xf8 PF: > { %s209_s29 = sand.u32 1, %s414_s9   ;;  %p621_p7 = scmp.ne.s32.totalorder %s616_s22, 0 }
  0xf9   : > { %p622_p10 = scmp.ge.s32.totalorder %s426_s12, 2  ;;  %s210_s20 = scalar_lea.sflag [#allocation4], %s209_s29 }
  0xfb   : > { %p289_p2 = pnand %p622_p10, %p621_p7 }
  0xfd   : > { %409 = dma.done.wait (!%p289_p2), %s210_s20, 128  }
  0xfe   : > { %411 = vsyncadd (!%p289_p2), %s210_s20, 4294967168  ;;  %p15_p4 = scmp.ge.s32.totalorder %s470_s15, 4   ;;  %s623_s9 = smov %s418_s10 }
  0xff   : > { %s624_s10 = smov %s422_s11  ;;  %s625_s11 = smov %s482_s18 }
 0x100   : > { %s626_s12 = smov %s470_s15  ;;  %17 = sbr.rel (!%p15_p4) target bundleno = 5 (0x5), region = 73 }
 0x107   :  { %215 = vsyncpa [#allocation3], 1 }
 0x108   :  { %217 = vsyncpa [#allocation3 + $0x1], 1 }
 0x109   :  { %218 = vsyncpa [#allocation4], 1 }
 0x10a   :  { %220 = vsyncpa [#allocation4 + $0x1], 1 }

</bundles_post_ra>
